<compile_context>
chip_gen: v5e
topology: v5e:2x2
jax: 0.10.0
libtpu: 0.0.40
codegen_flags: <defaults>
</compile_context>

<pallas_src>
import functools
import math

import numpy as np
import jax
import jax.numpy as jnp
from jax.experimental import pallas as pl
from jax.experimental.pallas import tpu as pltpu


def _build_pe(d_seq: int, d_embedding: int) -> np.ndarray:
    """Vectorized, matches the PyTorch __init__ double loop exactly."""
    assert d_embedding % 2 == 0, "PositionalEmbedding requires even d_embedding"
    pos = np.arange(d_seq, dtype=np.float64)[:, None]                 # (S, 1)
    i_even = np.arange(0, d_embedding, 2, dtype=np.float64)[None, :]  # (1, D/2)
    pe = np.zeros((d_seq, d_embedding), dtype=np.float64)
    # pe[pos, i]   = sin(pos / 10000 ** (2 * i       / d))
    # pe[pos, i+1] = cos(pos / 10000 ** (2 * (i + 1) / d))   (as written in the module)
    pe[:, 0::2] = np.sin(pos / np.power(10000.0, 2.0 * i_even / d_embedding))
    pe[:, 1::2] = np.cos(pos / np.power(10000.0, 2.0 * (i_even + 1.0) / d_embedding))
    return pe.astype(np.float32)[None, :, :]                          # (1, S, D)


def _pos_emb_kernel(x_ref, pe_ref, o_ref, *, scale):
    # x_ref: (TB, TL), pe_ref: (1, TL) broadcast over the sublane (row) axis.
    o_ref[...] = x_ref[...] * scale + pe_ref[...]


def _largest_divisor_tile(n: int, align: int, max_tile: int) -> int:
    """Largest divisor of n that is a multiple of `align` and <= max_tile.
    Falls back to n (full extent, always a legal block dim) if none exists."""
    if n <= max_tile:
        return n
    best = n
    for cand in range(align, max_tile + 1, align):
        if n % cand == 0:
            best = cand
    return best if best <= max_tile else n


def positional_embedding(x: jax.Array, pe: jax.Array, d_embedding: int) -> jax.Array:
    """x: (B, S, D) float32; pe: (1, S_pe>=S, D) float32 -> (B, S, D)."""
    B, S, D = x.shape
    scale = math.sqrt(d_embedding)

    # Flatten to a lane-dense 2-D view: last axis = S*D (multiple of 128 for
    # typical D); pe flattens identically and broadcasts over the batch rows.
    SD = S * D
    x2 = jnp.reshape(x, (B, SD))
    pe2 = jnp.reshape(pe[:, :S, :], (1, SD))

    # Tile sizes: lane tiles up to 8192 elements, row tiles capped so one f32
    # x tile is <= ~4 MiB (comfortably double-buffered on all generations).
    TL = _largest_divisor_tile(SD, 128, 8192)
    max_rows = max(8, (4 * 1024 * 1024) // (4 * TL))
    TB = _largest_divisor_tile(B, 8, max_rows)

    # Column tiles are the OUTER grid axis; pe's block index only depends on it,
    # so pe stays resident in VMEM across all inner (row-tile) iterations.
    grid = (SD // TL, B // TB)

    kernel = functools.partial(_pos_emb_kernel, scale=scale)
    itemsize = x.dtype.itemsize

    out2 = pl.pallas_call(
        kernel,
        out_shape=jax.ShapeDtypeStruct((B, SD), x.dtype),
        grid_spec=pltpu.PrefetchScalarGridSpec(
            num_scalar_prefetch=0,
            grid=grid,
            in_specs=[
                pl.BlockSpec((TB, TL), lambda c, r: (r, c)),   # x row/col tile
                pl.BlockSpec((1, TL), lambda c, r: (0, c)),    # pe: resident over inner axis
            ],
            out_specs=pl.BlockSpec((TB, TL), lambda c, r: (r, c)),
        ),
        compiler_params=pltpu.CompilerParams(
            dimension_semantics=("parallel", "parallel"),
            vmem_limit_bytes=48 * 1024 * 1024,  # tiles sized well under this; fits v7x's 64 MiB
        ),
        cost_estimate=pl.CostEstimate(
            flops=2 * B * SD,
            transcendentals=0,
            bytes_accessed=(2 * B * SD + SD) * itemsize,  # read x + write out + pe once
        ),
    )(x2, pe2)
    return jnp.reshape(out2, (B, S, D))


if __name__ == "__main__":
    d_seq = 8
    d_embedding = 32
    batch = 2

    key = jax.random.PRNGKey(0)
    x = jax.random.normal(key, (batch, d_seq, d_embedding), dtype=jnp.float32)
    pe = jnp.asarray(_build_pe(d_seq, d_embedding))

    out = positional_embedding(x, pe, d_embedding)
    out = jax.block_until_ready(out)

    # Reference (plain JAX), mirroring: x * sqrt(D) + pe[:, :d_seq]
    ref = x * math.sqrt(d_embedding) + pe[:, :d_seq]
    np.testing.assert_allclose(np.asarray(out), np.asarray(ref), rtol=1e-6, atol=1e-6)

    print("KERNEL_OK")
</pallas_src>

<mosaic_0001>
module attributes {stable_mosaic.version = 11 : i64} {
  func.func @_pos_emb_kernel(%arg0: i32, %arg1: i32, %arg2: memref<2x256xf32, #tpu.memory_space<vmem>>, %arg3: memref<1x256xf32, #tpu.memory_space<vmem>>, %arg4: memref<2x256xf32, #tpu.memory_space<vmem>>) attributes {dimension_semantics = [#tpu.dimension_semantics<parallel>, #tpu.dimension_semantics<parallel>], iteration_bounds = array<i64: 1, 1>, scalar_prefetch = 0 : i64, scratch_operands = 0 : i64, tpu.core_type = #tpu.core_type<tc>, window_params = [{transform_indices = @transform_0, window_bounds = array<i64: 2, 256>}, {transform_indices = @transform_1, window_bounds = array<i64: 1, 256>}, {transform_indices = @transform_2, window_bounds = array<i64: 2, 256>}]} {
    %c0 = arith.constant 0 : index
    %c0_0 = arith.constant 0 : index
    %0 = vector.load %arg2[%c0, %c0_0] : memref<2x256xf32, #tpu.memory_space<vmem>>, vector<2x256xf32>
    %cst = arith.constant 5.65685415 : f32
    %1 = vector.broadcast %cst : f32 to vector<2x256xf32>
    %2 = arith.mulf %0, %1 : vector<2x256xf32>
    %c0_1 = arith.constant 0 : index
    %c0_2 = arith.constant 0 : index
    %3 = vector.load %arg3[%c0_1, %c0_2] : memref<1x256xf32, #tpu.memory_space<vmem>>, vector<1x256xf32>
    %4 = vector.broadcast %3 : vector<1x256xf32> to vector<2x256xf32>
    %5 = arith.addf %2, %4 : vector<2x256xf32>
    %c0_3 = arith.constant 0 : index
    %c0_4 = arith.constant 0 : index
    %6 = vector.load %arg4[%c0_3, %c0_4] : memref<2x256xf32, #tpu.memory_space<vmem>>, vector<2x256xf32>
    tpu.vector_store %arg4[%c0_3, %c0_4], %5 {strides = array<i32>} : memref<2x256xf32, #tpu.memory_space<vmem>>, vector<2x256xf32>,
    return
  }
  func.func @transform_0(%arg0: i32, %arg1: i32) -> (i32, i32) {
    %c0_i32 = arith.constant 0 : i32
    return %arg1, %arg0 : i32, i32
  }
  func.func @transform_1(%arg0: i32, %arg1: i32) -> (i32, i32) {
    %c0_i32 = arith.constant 0 : i32
    %c0_i32_0 = arith.constant 0 : i32
    return %c0_i32, %arg0 : i32, i32
  }
  func.func @transform_2(%arg0: i32, %arg1: i32) -> (i32, i32) {
    %c0_i32 = arith.constant 0 : i32
    return %arg1, %arg0 : i32, i32
  }
}

</mosaic_0001>

<bundles_post_ra>
// kernel: tpu_custom_call.1
= control target key start
LH: loop header
LB: loop body
LE: loop exit
PB: predicated region body
PF: predicated region fallthrough
CT: control target
= control target key end

     0   :  { %7 = vsyncpa [#allocation3], 0  ;;  %s178_s0 = inlined_call_operand.hbm [shape: f32[2,256], index: 0, kind: input, shape index: {}]   ;;  %s179_s1 = inlined_call_operand.hbm [shape: f32[1,256], index: 1, kind: input, shape index: {}]   ;;  %s180_s2 = inlined_call_operand.hbm [shape: f32[2,256], index: 2, kind: output, shape index: {}]  }
   0x1   :  { %8 = vsyncpa [#allocation6], 0 }
   0x2   :  { %9 = vsyncpa [#allocation4], 0  ;;  %s15_s11 = sshll.u32 %s178_s0, 4  ;;  %s151_s12 = smov [#allocation2]   ;;  %s16_s11 = int_to_ptr.hbm [resolvable:$true] %s15_s11 }
   0x3   :  { %s17_s13 = sshll.u32 %s151_s12, 4  ;;  %s26_s16 = sshll.u32 %s179_s1, 4  ;;  %s18_s13 = int_to_ptr.vmem [resolvable:$true] %s17_s13  ;;  %s27_s16 = int_to_ptr.hbm [resolvable:$true] %s26_s16 }
   0x4   :  { %20 = dma.hbm_to_vmem [thread:$0]  %s16_s11, 64, %s18_s13, [#allocation3]  }
   0x5   :  { %s152_s17 = smov [#allocation5]  }
   0x6   :  { %s28_s18 = sshll.u32 %s152_s17, 4  ;;  %s29_s18 = int_to_ptr.vmem [resolvable:$true] %s28_s18 }
   0x7   :  { %31 = dma.hbm_to_vmem [thread:$0]  %s27_s16, 32, %s29_s18, [#allocation6]  }
   0x8   :  { %145 = dma.done.wait [#allocation3], 64  }
   0x9   :  { %146 = vsyncadd [#allocation3], 4294967232 }
   0xa   :  { %147 = dma.done.wait [#allocation6], 32  }
   0xb   :  { %148 = vsyncadd [#allocation6], 4294967264  ;;  %v40_v0 = vld [vmem:[#allocation2] sm:$0xf]  ;;  %v42_v1 = vld [vmem:[#allocation5] sm:$0x3] }
   0xc   :  { %v44_v2 = vperm.slane %v42_v1, 0  ;;  %v45_v3 = vperm.slane %v42_v1, 1  ;;  %v41_v4 = vmul.f32 5.656854, %v40_v0  ;;  %vm47_vm0 = vcmask 1041408   ;;  %s153_s0 = smov [#allocation7]  }
   0xd   :  { %s57_s19 = sshll.u32 %s153_s0, 4  ;;  %s59_s21 = sshll.u32 %s180_s2, 4  ;;  %s58_s19 = int_to_ptr.vmem [resolvable:$true] %s57_s19  ;;  %s60_s21 = int_to_ptr.hbm [resolvable:$true] %s59_s21 }
   0xe   :  { %v46_v5 = vrot.slane %v45_v3, 6 }
  0x10   :  { %v48_v6 = vsel %vm47_vm0, %v44_v2, %v46_v5 }
  0x11   :  { %v50_v7 = vadd.f32 %v48_v6, %v41_v4 }
  0x13   :  { %51 = vst [vmem:[#allocation7] sm:$0xf] %v50_v7 }
  0x14   :  { %62 = dma.vmem_to_hbm [thread:$0]  %s58_s19, 64, %s60_s21, [#allocation4]  }
  0x15   :  { %149 = dma.done.wait [#allocation4], 64  }
  0x16   :  { %150 = vsyncadd [#allocation4], 4294967232 }
  0x17   :  { %67 = vsyncpa [#allocation3], 1 }
  0x18   :  { %68 = vsyncpa [#allocation6], 1 }
  0x19   :  { %69 = vsyncpa [#allocation4], 1 }

</bundles_post_ra>
